<compile_context>
chip_gen: v6e
topology: v6e:2x2x1
jax: 0.10.0
libtpu: 0.0.40
codegen_flags: <defaults>
</compile_context>

<pallas_src>
import functools

import numpy as np
import jax
import jax.numpy as jnp
from jax.experimental import pallas as pl
from jax.experimental.pallas import tpu as pltpu


# ----------------------------------------------------------------------------
# Skeleton bookkeeping (pure python, mirrors find_neighbor / SkeletonPool /
# SkeletonUnpool / SkeletonConv mask construction).
# ----------------------------------------------------------------------------
def calc_edge_mat(edges):
    n = len(edges)
    INF = 100000
    mat = [[INF] * n for _ in range(n)]
    for i in range(n):
        mat[i][i] = 0
    for i, a in enumerate(edges):
        for j, b in enumerate(edges):
            link = 0
            for x in range(2):
                for y in range(2):
                    if a[x] == b[y]:
                        link = 1
            if link:
                mat[i][j] = 1
    for k in range(n):
        for i in range(n):
            for j in range(n):
                mat[i][j] = min(mat[i][j], mat[i][k] + mat[k][j])
    return mat


def find_neighbor(edges, dist):
    mat = calc_edge_mat(edges)
    n = len(edges)
    nbr = [[j for j in range(n) if mat[i][j] <= dist] for i in range(n)]
    gp = list(nbr[0])
    for i in gp:
        nbr[i].append(n)
    gp.append(n)
    nbr.append(gp)
    return nbr


def skeleton_pool(edges, last_pool):
    """Returns (pooling_list, new_edges) exactly as SkeletonPool.__init__."""
    edge_num = len(edges) + 1
    seq_list, pooling_list, new_edges = [], [], []
    degree = [0] * 200
    for e in edges:
        degree[e[0]] += 1
        degree[e[1]] += 1

    def find_seq(j, seq):
        if degree[j] > 2 and j != 0:
            seq_list.append(seq)
            seq = []
        if degree[j] == 1:
            seq_list.append(seq)
            return
        for idx, e in enumerate(edges):
            if e[0] == j:
                find_seq(e[1], seq + [idx])

    find_seq(0, [])
    for seq in seq_list:
        if last_pool:
            pooling_list.append(seq)
            continue
        if len(seq) % 2 == 1:
            pooling_list.append([seq[0]])
            new_edges.append(list(edges[seq[0]]))
            seq = seq[1:]
        for i in range(0, len(seq), 2):
            pooling_list.append([seq[i], seq[i + 1]])
            new_edges.append([edges[seq[i]][0], edges[seq[i + 1]][1]])
    pooling_list.append([edge_num - 1])
    return pooling_list, new_edges


# ----------------------------------------------------------------------------
# Small dense helper matrices (host-side numpy constants, built once).
# ----------------------------------------------------------------------------
def upsample2x_matrix(t_in):
    """U s.t. x @ U == linear upsample x2, align_corners=False (PyTorch)."""
    t_out = 2 * t_in
    U = np.zeros((t_in, t_out), np.float32)
    for o in range(t_out):
        src = max((o + 0.5) / 2.0 - 0.5, 0.0)
        i0 = int(np.floor(src))
        i1 = min(i0 + 1, t_in - 1)
        lam = src - i0
        U[i0, o] += 1.0 - lam
        U[i1, o] += lam
    return U


def conv_shift_matrices(t, ksize, pad):
    """S[k] s.t. y @ S[k] == zero-padded shift of y by (k - pad) columns."""
    S = np.zeros((ksize, t, t), np.float32)
    for k in range(ksize):
        off = k - pad
        for col in range(t):
            src = col + off
            if 0 <= src < t:
                S[k, src, col] = 1.0
    return S


def upsample_shift_T(t_in, ksize, pad):
    """ukt[k] = (U_upsample @ S_shift[k])^T, shape (K, 2*t_in, t_in).

    Left-multiplying a time-major activation (t_in, C) by ukt[k] performs the
    x2 linear upsample followed by conv tap k's zero-padded time shift.
    SHARED across the batch (no block-diagonal, no O(B^2) terms).
    """
    U = upsample2x_matrix(t_in)                      # (t_in, t_out)
    S = conv_shift_matrices(2 * t_in, ksize, pad)    # (K, t_out, t_out)
    return np.stack([(U @ S[k]).T for k in range(ksize)]).astype(np.float32)


# ----------------------------------------------------------------------------
# Pallas kernel: the ENTIRE decoder for one batch element (grid axis = batch,
# marked "parallel").  refs = [x, (u_l, w_l, b_l) * num_layers, out].
# ----------------------------------------------------------------------------
def _fused_decoder_kernel(*refs, num_layers, ksize, lrelu):
    x_ref = refs[0]
    o_ref = refs[-1]
    h = x_ref[...]                                   # (T_in, C_in), channels on lanes
    for li in range(num_layers):
        u_ref, w_ref, b_ref = refs[1 + 3 * li: 4 + 3 * li]
        t_out = u_ref.shape[1]
        c_out = w_ref.shape[2]
        # bias folded into the accumulator init (saves one VPU pass per layer)
        acc = jnp.broadcast_to(b_ref[...], (t_out, c_out))
        for k in range(ksize):                       # static unrolled kernel taps
            # REORDERED: channel contraction first (C_out < C_in, rows = T_in),
            # then the time-expansion matmul on the smaller intermediate.
            gk = jnp.dot(h, w_ref[k], preferred_element_type=jnp.float32)          # (T_in, C_out)
            acc = acc + jnp.dot(u_ref[k], gk, preferred_element_type=jnp.float32)  # (T_out, C_out)
        if lrelu[li]:
            acc = jnp.where(acc >= 0.0, acc, 0.2 * acc)   # LeakyReLU(0.2)
        h = acc                                      # stays in VMEM/vregs, never HBM
    o_ref[...] = h.astype(o_ref.dtype)


@functools.partial(jax.jit, static_argnames=("d_rot",))
def decoder_forward_pallas(x, params, *, d_rot):
    """x: (B, C_latent, T_latent) NCT latent code; returns (B, joints, d, window)."""
    B, c0, t0 = x.shape
    xt = jnp.transpose(x, (0, 2, 1))                 # (B, T, C): time-major, channels-last
    num_layers = len(params)
    ksize = params[0][0].shape[0]
    lrelu = tuple(i != num_layers - 1 for i in range(num_layers))

    vmem = pltpu.MemorySpace.VMEM
    operands = [xt]
    in_specs = [pl.BlockSpec((None, t0, c0), lambda b: (b, 0, 0), memory_space=vmem)]
    flops = 0
    bytes_accessed = xt.size * 4
    t, c = t0, c0
    for ukt, wkt, b_row in params:
        K, t_out, t_in = ukt.shape
        c_in, c_out = wkt.shape[1], wkt.shape[2]
        assert (K, t_in, c_in) == (ksize, t, c), (ukt.shape, wkt.shape, t, c)
        operands += [ukt, wkt, b_row]
        in_specs += [
            pl.BlockSpec(ukt.shape, lambda b: (0, 0, 0), memory_space=vmem),
            pl.BlockSpec(wkt.shape, lambda b: (0, 0, 0), memory_space=vmem),
            pl.BlockSpec(b_row.shape, lambda b: (0, 0), memory_space=vmem),
        ]
        # reordered-form flop count (no B^2 structural zeros)
        flops += 2 * ksize * B * (t_in * c_in * c_out + t_out * t_in * c_out)
        bytes_accessed += (ukt.size + wkt.size + b_row.size) * 4
        t, c = t_out, c_out
    bytes_accessed += B * t * c * 4

    kernel = functools.partial(_fused_decoder_kernel, num_layers=num_layers,
                               ksize=ksize, lrelu=lrelu)
    out = pl.pallas_call(
        kernel,
        grid=(B,),
        in_specs=in_specs,
        out_specs=pl.BlockSpec((None, t, c), lambda b: (b, 0, 0), memory_space=vmem),
        out_shape=jax.ShapeDtypeStruct((B, t, c), x.dtype),
        compiler_params=pltpu.CompilerParams(dimension_semantics=("parallel",)),
        cost_estimate=pl.CostEstimate(flops=flops, transcendentals=0,
                                      bytes_accessed=bytes_accessed),
    )(*operands)

    # TODO(synk): format_rotation treated as identity (rotation_data == rotation == 'rotation_6d').
    y = jnp.transpose(out, (0, 2, 1))                # back to (B, C, T)
    return y.reshape(B, c // d_rot, d_rot, t)        # (B, joints, 6, window_size)


# ----------------------------------------------------------------------------
# Build Encoder bookkeeping + deterministic Decoder parameters (+ folded forms).
# All kernel constants (ukt, folded weights, bias rows) are built ONCE here as
# device arrays; decoder_forward_pallas is jitted and just consumes them.
# ----------------------------------------------------------------------------
def build_decoder(key, edges, *, num_layers, scale_factor, skeleton_dist,
                  ksize, d_rot, window_size):
    pad = (ksize - 1) // 2
    # --- Encoder.__init__ bookkeeping ---
    channel_base = [d_rot]
    for _ in range(num_layers):
        channel_base.append(channel_base[-1] * scale_factor)
    topologies = [list(edges)]
    edge_num = [len(edges) + 1]
    channel_list = []
    pooling_lists = []
    for i in range(num_layers):
        in_ch = channel_base[i] * edge_num[i]
        out_ch = channel_base[i + 1] * edge_num[i]
        if i == 0:
            channel_list.append(in_ch)
        channel_list.append(out_ch)
        plist, new_edges = skeleton_pool(topologies[i], last_pool=(i == num_layers - 1))
        topologies.append(new_edges)
        pooling_lists.append(plist)
        edge_num.append(len(new_edges) + 1)

    # --- Decoder.__init__ parameters + host-side folding ---
    params = []       # kernel operands per layer: (ukt, wkt, b_row)
    ref_layers = []   # unfused parameters for the pure-JAX reference
    t_in = window_size // (2 ** num_layers)
    for i in range(num_layers):
        in_ch = channel_list[num_layers - i]
        out_ch = in_ch // scale_factor
        topo = topologies[num_layers - i - 1]
        nbr = find_neighbor(topo, skeleton_dist)
        joint_num = edge_num[num_layers - i - 1]
        plist = pooling_lists[num_layers - i - 1]
        use_bias = (i == 0 or i == num_layers - 1)

        # robustness: divisions below must be exact for this topology
        assert in_ch % len(nbr) == 0 and in_ch % joint_num == 0 and out_ch % joint_num == 0

        # SkeletonUnpool weight (maps pooled channels -> unpooled channels)
        cpe = in_ch // len(nbr)
        out_edge = sum(len(t) for t in plist)
        Wun = np.zeros((out_edge * cpe, len(plist) * cpe), np.float32)
        for a, pair in enumerate(plist):
            for j in pair:
                for ci in range(cpe):
                    Wun[j * cpe + ci, a * cpe + ci] = 1.0
        assert out_edge * cpe == in_ch

        # masked SkeletonConv weight
        in_cpj = in_ch // joint_num
        out_cpj = out_ch // joint_num
        mask = np.zeros((out_ch, in_ch, ksize), np.float32)
        for a, nb in enumerate(nbr):
            idx = [k * in_cpj + ci for k in nb for ci in range(in_cpj)]
            mask[out_cpj * a: out_cpj * (a + 1), idx, :] = 1.0
        key, k1, k2 = jax.random.split(key, 3)
        w = jax.random.normal(k1, (out_ch, in_ch, ksize), jnp.float32) * 0.1
        w = jnp.asarray(mask) * w                 # weight * mask (as in forward)
        if use_bias:
            b = jax.random.normal(k2, (out_ch,), jnp.float32) * 0.1
        else:
            b = jnp.zeros((out_ch,), jnp.float32)

        # fold unpool into conv weight, transposed for the channels-last layout:
        #   wkt[k] = (w[:,:,k] @ Wun)^T           (C_prev, C_out)
        wu_j = jnp.asarray(Wun)                               # (C_unpooled, C_prev)
        wc = jnp.transpose(w, (2, 0, 1))                      # (K, C_out, C_unpooled)
        wkt = jnp.einsum('kou,ui->kio', wc, wu_j)             # (K, C_prev, C_out)

        # per-tap (upsample @ zero-pad shift)^T, shared across batch
        ukt = jnp.asarray(upsample_shift_T(t_in, ksize, pad))  # (K, 2*t_in, t_in)

        params.append((ukt, wkt, b.reshape(1, out_ch)))
        ref_layers.append(dict(wu=wu_j, w_ncK=w, b_col=b.reshape(out_ch, 1),
                               apply_lrelu=(i != num_layers - 1)))
        t_in *= 2

    latent_channels = int(params[0][1].shape[1])
    return tuple(params), ref_layers, latent_channels, pad


# ----------------------------------------------------------------------------
# Pure-JAX reference (unfused, NCT layout) for correctness checking.
# ----------------------------------------------------------------------------
def _upsample2x_ref(x):
    x_prev = jnp.concatenate([x[..., :1], x[..., :-1]], axis=-1)
    x_next = jnp.concatenate([x[..., 1:], x[..., -1:]], axis=-1)
    even = 0.25 * x_prev + 0.75 * x
    odd = 0.75 * x + 0.25 * x_next
    return jnp.stack([even, odd], axis=-1).reshape(x.shape[0], x.shape[1], -1)


def decoder_forward_ref(x, layers, ksize, pad, d_rot):
    for p in layers:
        x = _upsample2x_ref(x)
        x = jnp.einsum('oc,bct->bot', p['wu'], x)
        T = x.shape[-1]
        xp = jnp.pad(x, ((0, 0), (0, 0), (pad, pad)))
        out = jnp.broadcast_to(p['b_col'][None], (x.shape[0], p['b_col'].shape[0], T))
        for k in range(ksize):
            out = out + jnp.einsum('oc,bct->bot', p['w_ncK'][:, :, k], xp[:, :, k:k + T])
        if p['apply_lrelu']:
            out = jnp.where(out >= 0.0, out, 0.2 * out)
        x = out
    B, C, T = x.shape
    return x.reshape(B, C // d_rot, d_rot, T)


# ----------------------------------------------------------------------------
if __name__ == "__main__":
    # Small skeleton: 7 joints, 6 edges (two chains from the root).
    edges = [(0, 1), (1, 2), (2, 3), (0, 4), (4, 5), (5, 6)]
    NUM_LAYERS = 2
    SCALE_FACTOR = 2
    SKELETON_DIST = 2
    KSIZE = 3
    D_ROT = 6                     # rotation_6d
    WINDOW_SIZE = 16
    BATCH = 2

    key = jax.random.PRNGKey(0)
    key, k_params, k_x = jax.random.split(key, 3)
    params, ref_layers, latent_ch, pad = build_decoder(
        k_params, edges, num_layers=NUM_LAYERS, scale_factor=SCALE_FACTOR,
        skeleton_dist=SKELETON_DIST, ksize=KSIZE, d_rot=D_ROT,
        window_size=WINDOW_SIZE)

    t_latent = WINDOW_SIZE // (2 ** NUM_LAYERS)
    # Latent code (encoder output): (batch, channels, time) = (2, 72, 4)
    x = jax.random.normal(k_x, (BATCH, latent_ch, t_latent), jnp.float32)

    out = decoder_forward_pallas(x, params, d_rot=D_ROT)
    out = jax.block_until_ready(out)

    ref = decoder_forward_ref(x, ref_layers, KSIZE, pad, D_ROT)
    ref = jax.block_until_ready(ref)

    assert out.shape == (BATCH, len(edges) + 1, D_ROT, WINDOW_SIZE), out.shape
    np.testing.assert_allclose(np.asarray(out), np.asarray(ref),
                               rtol=1e-4, atol=1e-4)
    print("KERNEL_OK")
</pallas_src>

<mosaic_0001>
module attributes {stable_mosaic.version = 11 : i64} {
  func.func @_fused_decoder_kernel(%arg0: i32, %arg1: memref<1x4x72xf32, #tpu.memory_space<vmem>>, %arg2: memref<3x8x4xf32, #tpu.memory_space<vmem>>, %arg3: memref<3x72x60xf32, #tpu.memory_space<vmem>>, %arg4: memref<1x60xf32, #tpu.memory_space<vmem>>, %arg5: memref<3x16x8xf32, #tpu.memory_space<vmem>>, %arg6: memref<3x60x42xf32, #tpu.memory_space<vmem>>, %arg7: memref<1x42xf32, #tpu.memory_space<vmem>>, %arg8: memref<1x16x42xf32, #tpu.memory_space<vmem>>) attributes {dimension_semantics = [#tpu.dimension_semantics<parallel>], iteration_bounds = array<i64: 2>, scalar_prefetch = 0 : i64, scratch_operands = 0 : i64, tpu.core_type = #tpu.core_type<tc>, window_params = [{transform_indices = @transform_0, window_bounds = array<i64: 1, 4, 72>}, {pipeline_mode = #tpu.pipeline_mode<synchronous>, transform_indices = @transform_1, window_bounds = array<i64: 3, 8, 4>}, {pipeline_mode = #tpu.pipeline_mode<synchronous>, transform_indices = @transform_2, window_bounds = array<i64: 3, 72, 60>}, {pipeline_mode = #tpu.pipeline_mode<synchronous>, transform_indices = @transform_3, window_bounds = array<i64: 1, 60>}, {pipeline_mode = #tpu.pipeline_mode<synchronous>, transform_indices = @transform_4, window_bounds = array<i64: 3, 16, 8>}, {pipeline_mode = #tpu.pipeline_mode<synchronous>, transform_indices = @transform_5, window_bounds = array<i64: 3, 60, 42>}, {pipeline_mode = #tpu.pipeline_mode<synchronous>, transform_indices = @transform_6, window_bounds = array<i64: 1, 42>}, {transform_indices = @transform_7, window_bounds = array<i64: 1, 16, 42>}]} {
    %c0 = arith.constant 0 : index
    %c0_0 = arith.constant 0 : index
    %c0_1 = arith.constant 0 : index
    %0 = vector.load %arg1[%c0, %c0_0, %c0_1] : memref<1x4x72xf32, #tpu.memory_space<vmem>>, vector<1x4x72xf32>
    %1 = vector.shape_cast %0 : vector<1x4x72xf32> to vector<4x72xf32>
    %c0_2 = arith.constant 0 : index
    %c0_3 = arith.constant 0 : index
    %2 = vector.load %arg4[%c0_2, %c0_3] : memref<1x60xf32, #tpu.memory_space<vmem>>, vector<1x60xf32>
    %3 = vector.shape_cast %2 : vector<1x60xf32> to vector<1x60xf32>
    %4 = vector.broadcast %3 : vector<1x60xf32> to vector<8x60xf32>
    %c0_4 = arith.constant 0 : index
    %c0_5 = arith.constant 0 : index
    %c0_6 = arith.constant 0 : index
    %5 = vector.load %arg3[%c0_4, %c0_5, %c0_6] : memref<3x72x60xf32, #tpu.memory_space<vmem>>, vector<1x72x60xf32>
    %6 = vector.shape_cast %5 : vector<1x72x60xf32> to vector<72x60xf32>
    %cst = arith.constant dense<0.000000e+00> : vector<4x60xf32>
    %7 = tpu.matmul %1, %6, %cst {dimension_numbers = #tpu.dot_dimension_numbers<[1], [0], [0], [1], [0, 0, 1, 1], [], []>} : vector<4x72xf32>, vector<72x60xf32>, vector<4x60xf32> -> vector<4x60xf32>
    %c0_7 = arith.constant 0 : index
    %c0_8 = arith.constant 0 : index
    %c0_9 = arith.constant 0 : index
    %8 = vector.load %arg2[%c0_7, %c0_8, %c0_9] : memref<3x8x4xf32, #tpu.memory_space<vmem>>, vector<1x8x4xf32>
    %9 = vector.shape_cast %8 : vector<1x8x4xf32> to vector<8x4xf32>
    %cst_10 = arith.constant dense<0.000000e+00> : vector<8x60xf32>
    %10 = tpu.matmul %9, %7, %cst_10 {dimension_numbers = #tpu.dot_dimension_numbers<[1], [0], [0], [1], [0, 0, 1, 1], [], []>} : vector<8x4xf32>, vector<4x60xf32>, vector<8x60xf32> -> vector<8x60xf32>
    %11 = arith.addf %4, %10 : vector<8x60xf32>
    %c1 = arith.constant 1 : index
    %c0_11 = arith.constant 0 : index
    %c0_12 = arith.constant 0 : index
    %12 = vector.load %arg3[%c1, %c0_11, %c0_12] : memref<3x72x60xf32, #tpu.memory_space<vmem>>, vector<1x72x60xf32>
    %13 = vector.shape_cast %12 : vector<1x72x60xf32> to vector<72x60xf32>
    %cst_13 = arith.constant dense<0.000000e+00> : vector<4x60xf32>
    %14 = tpu.matmul %1, %13, %cst_13 {dimension_numbers = #tpu.dot_dimension_numbers<[1], [0], [0], [1], [0, 0, 1, 1], [], []>} : vector<4x72xf32>, vector<72x60xf32>, vector<4x60xf32> -> vector<4x60xf32>
    %c1_14 = arith.constant 1 : index
    %c0_15 = arith.constant 0 : index
    %c0_16 = arith.constant 0 : index
    %15 = vector.load %arg2[%c1_14, %c0_15, %c0_16] : memref<3x8x4xf32, #tpu.memory_space<vmem>>, vector<1x8x4xf32>
    %16 = vector.shape_cast %15 : vector<1x8x4xf32> to vector<8x4xf32>
    %cst_17 = arith.constant dense<0.000000e+00> : vector<8x60xf32>
    %17 = tpu.matmul %16, %14, %cst_17 {dimension_numbers = #tpu.dot_dimension_numbers<[1], [0], [0], [1], [0, 0, 1, 1], [], []>} : vector<8x4xf32>, vector<4x60xf32>, vector<8x60xf32> -> vector<8x60xf32>
    %18 = arith.addf %11, %17 : vector<8x60xf32>
    %c2 = arith.constant 2 : index
    %c0_18 = arith.constant 0 : index
    %c0_19 = arith.constant 0 : index
    %19 = vector.load %arg3[%c2, %c0_18, %c0_19] : memref<3x72x60xf32, #tpu.memory_space<vmem>>, vector<1x72x60xf32>
    %20 = vector.shape_cast %19 : vector<1x72x60xf32> to vector<72x60xf32>
    %cst_20 = arith.constant dense<0.000000e+00> : vector<4x60xf32>
    %21 = tpu.matmul %1, %20, %cst_20 {dimension_numbers = #tpu.dot_dimension_numbers<[1], [0], [0], [1], [0, 0, 1, 1], [], []>} : vector<4x72xf32>, vector<72x60xf32>, vector<4x60xf32> -> vector<4x60xf32>
    %c2_21 = arith.constant 2 : index
    %c0_22 = arith.constant 0 : index
    %c0_23 = arith.constant 0 : index
    %22 = vector.load %arg2[%c2_21, %c0_22, %c0_23] : memref<3x8x4xf32, #tpu.memory_space<vmem>>, vector<1x8x4xf32>
    %23 = vector.shape_cast %22 : vector<1x8x4xf32> to vector<8x4xf32>
    %cst_24 = arith.constant dense<0.000000e+00> : vector<8x60xf32>
    %24 = tpu.matmul %23, %21, %cst_24 {dimension_numbers = #tpu.dot_dimension_numbers<[1], [0], [0], [1], [0, 0, 1, 1], [], []>} : vector<8x4xf32>, vector<4x60xf32>, vector<8x60xf32> -> vector<8x60xf32>
    %25 = arith.addf %18, %24 : vector<8x60xf32>
    %cst_25 = arith.constant 0.000000e+00 : f32
    %26 = vector.broadcast %cst_25 : f32 to vector<8x60xf32>
    %27 = arith.cmpf oge, %25, %26 : vector<8x60xf32>
    %cst_26 = arith.constant 2.000000e-01 : f32
    %28 = vector.broadcast %cst_26 : f32 to vector<8x60xf32>
    %29 = arith.mulf %28, %25 : vector<8x60xf32>
    %30 = arith.select %27, %25, %29 : vector<8x60xi1>, vector<8x60xf32>
    %c0_27 = arith.constant 0 : index
    %c0_28 = arith.constant 0 : index
    %31 = vector.load %arg7[%c0_27, %c0_28] : memref<1x42xf32, #tpu.memory_space<vmem>>, vector<1x42xf32>
    %32 = vector.shape_cast %31 : vector<1x42xf32> to vector<1x42xf32>
    %33 = vector.broadcast %32 : vector<1x42xf32> to vector<16x42xf32>
    %c0_29 = arith.constant 0 : index
    %c0_30 = arith.constant 0 : index
    %c0_31 = arith.constant 0 : index
    %34 = vector.load %arg6[%c0_29, %c0_30, %c0_31] : memref<3x60x42xf32, #tpu.memory_space<vmem>>, vector<1x60x42xf32>
    %35 = vector.shape_cast %34 : vector<1x60x42xf32> to vector<60x42xf32>
    %cst_32 = arith.constant dense<0.000000e+00> : vector<8x42xf32>
    %36 = tpu.matmul %30, %35, %cst_32 {dimension_numbers = #tpu.dot_dimension_numbers<[1], [0], [0], [1], [0, 0, 1, 1], [], []>} : vector<8x60xf32>, vector<60x42xf32>, vector<8x42xf32> -> vector<8x42xf32>
    %c0_33 = arith.constant 0 : index
    %c0_34 = arith.constant 0 : index
    %c0_35 = arith.constant 0 : index
    %37 = vector.load %arg5[%c0_33, %c0_34, %c0_35] : memref<3x16x8xf32, #tpu.memory_space<vmem>>, vector<1x16x8xf32>
    %38 = vector.shape_cast %37 : vector<1x16x8xf32> to vector<16x8xf32>
    %cst_36 = arith.constant dense<0.000000e+00> : vector<16x42xf32>
    %39 = tpu.matmul %38, %36, %cst_36 {dimension_numbers = #tpu.dot_dimension_numbers<[1], [0], [0], [1], [0, 0, 1, 1], [], []>} : vector<16x8xf32>, vector<8x42xf32>, vector<16x42xf32> -> vector<16x42xf32>
    %40 = arith.addf %33, %39 : vector<16x42xf32>
    %c1_37 = arith.constant 1 : index
    %c0_38 = arith.constant 0 : index
    %c0_39 = arith.constant 0 : index
    %41 = vector.load %arg6[%c1_37, %c0_38, %c0_39] : memref<3x60x42xf32, #tpu.memory_space<vmem>>, vector<1x60x42xf32>
    %42 = vector.shape_cast %41 : vector<1x60x42xf32> to vector<60x42xf32>
    %cst_40 = arith.constant dense<0.000000e+00> : vector<8x42xf32>
    %43 = tpu.matmul %30, %42, %cst_40 {dimension_numbers = #tpu.dot_dimension_numbers<[1], [0], [0], [1], [0, 0, 1, 1], [], []>} : vector<8x60xf32>, vector<60x42xf32>, vector<8x42xf32> -> vector<8x42xf32>
    %c1_41 = arith.constant 1 : index
    %c0_42 = arith.constant 0 : index
    %c0_43 = arith.constant 0 : index
    %44 = vector.load %arg5[%c1_41, %c0_42, %c0_43] : memref<3x16x8xf32, #tpu.memory_space<vmem>>, vector<1x16x8xf32>
    %45 = vector.shape_cast %44 : vector<1x16x8xf32> to vector<16x8xf32>
    %cst_44 = arith.constant dense<0.000000e+00> : vector<16x42xf32>
    %46 = tpu.matmul %45, %43, %cst_44 {dimension_numbers = #tpu.dot_dimension_numbers<[1], [0], [0], [1], [0, 0, 1, 1], [], []>} : vector<16x8xf32>, vector<8x42xf32>, vector<16x42xf32> -> vector<16x42xf32>
    %47 = arith.addf %40, %46 : vector<16x42xf32>
    %c2_45 = arith.constant 2 : index
    %c0_46 = arith.constant 0 : index
    %c0_47 = arith.constant 0 : index
    %48 = vector.load %arg6[%c2_45, %c0_46, %c0_47] : memref<3x60x42xf32, #tpu.memory_space<vmem>>, vector<1x60x42xf32>
    %49 = vector.shape_cast %48 : vector<1x60x42xf32> to vector<60x42xf32>
    %cst_48 = arith.constant dense<0.000000e+00> : vector<8x42xf32>
    %50 = tpu.matmul %30, %49, %cst_48 {dimension_numbers = #tpu.dot_dimension_numbers<[1], [0], [0], [1], [0, 0, 1, 1], [], []>} : vector<8x60xf32>, vector<60x42xf32>, vector<8x42xf32> -> vector<8x42xf32>
    %c2_49 = arith.constant 2 : index
    %c0_50 = arith.constant 0 : index
    %c0_51 = arith.constant 0 : index
    %51 = vector.load %arg5[%c2_49, %c0_50, %c0_51] : memref<3x16x8xf32, #tpu.memory_space<vmem>>, vector<1x16x8xf32>
    %52 = vector.shape_cast %51 : vector<1x16x8xf32> to vector<16x8xf32>
    %cst_52 = arith.constant dense<0.000000e+00> : vector<16x42xf32>
    %53 = tpu.matmul %52, %50, %cst_52 {dimension_numbers = #tpu.dot_dimension_numbers<[1], [0], [0], [1], [0, 0, 1, 1], [], []>} : vector<16x8xf32>, vector<8x42xf32>, vector<16x42xf32> -> vector<16x42xf32>
    %54 = arith.addf %47, %53 : vector<16x42xf32>
    %c0_53 = arith.constant 0 : index
    %c0_54 = arith.constant 0 : index
    %c0_55 = arith.constant 0 : index
    %55 = vector.load %arg8[%c0_53, %c0_54, %c0_55] : memref<1x16x42xf32, #tpu.memory_space<vmem>>, vector<1x16x42xf32>
    %56 = vector.shape_cast %55 : vector<1x16x42xf32> to vector<16x42xf32>
    %57 = vector.shape_cast %54 : vector<16x42xf32> to vector<1x16x42xf32>
    tpu.vector_store %arg8[%c0_53, %c0_54, %c0_55], %57 {strides = array<i32>} : memref<1x16x42xf32, #tpu.memory_space<vmem>>, vector<1x16x42xf32>,
    return
  }
  func.func @transform_0(%arg0: i32) -> (i32, i32, i32) {
    %c0_i32 = arith.constant 0 : i32
    %c0_i32_0 = arith.constant 0 : i32
    %c0_i32_1 = arith.constant 0 : i32
    return %arg0, %c0_i32, %c0_i32_0 : i32, i32, i32
  }
  func.func @transform_1(%arg0: i32) -> (i32, i32, i32) {
    %c0_i32 = arith.constant 0 : i32
    %c0_i32_0 = arith.constant 0 : i32
    %c0_i32_1 = arith.constant 0 : i32
    %c0_i32_2 = arith.constant 0 : i32
    return %c0_i32, %c0_i32_0, %c0_i32_1 : i32, i32, i32
  }
  func.func @transform_2(%arg0: i32) -> (i32, i32, i32) {
    %c0_i32 = arith.constant 0 : i32
    %c0_i32_0 = arith.constant 0 : i32
    %c0_i32_1 = arith.constant 0 : i32
    %c0_i32_2 = arith.constant 0 : i32
    return %c0_i32, %c0_i32_0, %c0_i32_1 : i32, i32, i32
  }
  func.func @transform_3(%arg0: i32) -> (i32, i32) {
    %c0_i32 = arith.constant 0 : i32
    %c0_i32_0 = arith.constant 0 : i32
    %c0_i32_1 = arith.constant 0 : i32
    return %c0_i32, %c0_i32_0 : i32, i32
  }
  func.func @transform_4(%arg0: i32) -> (i32, i32, i32) {
    %c0_i32 = arith.constant 0 : i32
    %c0_i32_0 = arith.constant 0 : i32
    %c0_i32_1 = arith.constant 0 : i32
    %c0_i32_2 = arith.constant 0 : i32
    return %c0_i32, %c0_i32_0, %c0_i32_1 : i32, i32, i32
  }
  func.func @transform_5(%arg0: i32) -> (i32, i32, i32) {
    %c0_i32 = arith.constant 0 : i32
    %c0_i32_0 = arith.constant 0 : i32
    %c0_i32_1 = arith.constant 0 : i32
    %c0_i32_2 = arith.constant 0 : i32
    return %c0_i32, %c0_i32_0, %c0_i32_1 : i32, i32, i32
  }
  func.func @transform_6(%arg0: i32) -> (i32, i32) {
    %c0_i32 = arith.constant 0 : i32
    %c0_i32_0 = arith.constant 0 : i32
    %c0_i32_1 = arith.constant 0 : i32
    return %c0_i32, %c0_i32_0 : i32, i32
  }
  func.func @transform_7(%arg0: i32) -> (i32, i32, i32) {
    %c0_i32 = arith.constant 0 : i32
    %c0_i32_0 = arith.constant 0 : i32
    %c0_i32_1 = arith.constant 0 : i32
    return %arg0, %c0_i32, %c0_i32_0 : i32, i32, i32
  }
}

</mosaic_0001>

<bundles_post_ra>
// kernel: decoder_forward_pallas.1
= control target key start
LH: loop header
LB: loop body
LE: loop exit
PB: predicated region body
PF: predicated region fallthrough
CT: control target
= control target key end

     0   :  { %s1696_s24 = smov 0   ;;  %s2006_s0 = inlined_call_operand.vmem [shape: f32[2,4,72], index: 0, kind: input, shape index: {}]   ;;  %s2007_s1 = inlined_call_operand.vmem [shape: f32[3,8,4], index: 1, kind: input, shape index: {}]   ;;  %s2008_s2 = inlined_call_operand.vmem [shape: f32[3,72,60], index: 2, kind: input, shape index: {}]   ;;  %s2009_s3 = inlined_call_operand.vmem [shape: f32[1,60], index: 3, kind: input, shape index: {}]   ;;  %s2010_s4 = inlined_call_operand.vmem [shape: f32[3,16,8], index: 4, kind: input, shape index: {}]   ;;  %s2011_s5 = inlined_call_operand.vmem [shape: f32[3,60,42], index: 5, kind: input, shape index: {}]   ;;  %s2012_s6 = inlined_call_operand.vmem [shape: f32[1,42], index: 6, kind: input, shape index: {}]   ;;  %s2013_s7 = inlined_call_operand.vmem [shape: f32[2,16,42], index: 7, kind: output, shape index: {}]  }
   0x1 LB: > { %s1340_s25 = sadd.s32 4294967295, %s1652_s24   ;;  %p1344_p0 = scmp.ge.s32.totalorder %s1652_s24, 1  ;;  %s1652_s24 = sphi %s1696_s24, %s17_s24  }
   0x2   : > { %p236_p1 = scmp.lt.s32.totalorder %s1652_s24, 3 }
   0x4   : > { %p237_p2 = pnand %p1344_p0, %p236_p1 }
   0x5   : > { %p267_p3 = scmp.lt.s32.totalorder (!%p237_p2), %s1340_s25, 1 }
   0x6   : > { %240 = sbr.rel (%p237_p2) target bundleno = 1272 (0x4f8), region = 48 }
   0xb   : > { %v292_v0 = vld [vmem:[%s2008_s2 + $0x40] sm:$0xff]  ;;  %v1654_v1 = vmov 0.0   ;;  %v291_v2 = vld [vmem:[%s2008_s2 + $0x38] sm:$0xff]  ;;  %vm1655_vm0 = vmmov 0   ;;  %v290_v3 = vld [vmem:[%s2008_s2 + $0x30] sm:$0xff]  ;;  %s2015_s25 = smov (!%p267_p3, %s1340_s25), 1 }
   0xc   : > { %1486 = vmatprep.subr.mxu0 %v1654_v1  ;;  %1504 = vmatprep.mubr.msk.f32.mxu0 %vm1655_vm0, %v1654_v1  ;;  %v289_v4 = vld [vmem:[%s2008_s2 + $0x28] sm:$0xff]  ;;  %v288_v5 = vld [vmem:[%s2008_s2 + $0x20] sm:$0xff]  ;;  %v287_v6 = vld [vmem:[%s2008_s2 + $0x18] sm:$0xff]  ;;  %s1345_s15 = sshll.u32 %s2015_s25, 2  ;;  %vm293_vm1 = vcmask 588800   ;;  %vm372_vm2 = vcmask 1043456  }
   0xd   : > { %1487 = vmatpush3.msra.mxu0 %v292_v0  ;;  %1507 = vmatprep.subr.mxu1 %v1654_v1  ;;  %v286_v7 = vld [vmem:[%s2008_s2 + $0x10] sm:$0xff]  ;;  %v285_v8 = vld [vmem:[%s2008_s2 + $0x8] sm:$0xff]  ;;  %s270_s22 = scalar_lea.vmem %s2006_s0, %s1345_s15  ;;  %v284_v9 = vld [vmem:[%s2008_s2] sm:$0xff]  ;;  %vm368_vm3 = vcmask 31744   ;;  %vm783_vm5 = vcmask 490496   ;;  %vm862_vm6 = vcmask 64512  }
   0xe   : > { %1488 = vmatprep.subr.mxu0 %v1654_v1  ;;  %1509 = vmatprep.mubr.msk.f32.mxu1 %vm1655_vm0, %v1654_v1  ;;  %v1750_v10 = vld [vmem:[%s270_s22] sm:$0xf]  ;;  %v1360_v13 = vld [vmem:[%s2008_s2 + $0x88] sm:$0xff]  ;;  %v1358_v16 = vld [vmem:[%s2008_s2 + $0x78] sm:$0xff]  ;;  %s1413_s28 = sshll.u32 %s2015_s25, 4  ;;  %vm1282_vm7 = vcmask 343040  }
   0xf   : > { %1489 = vmatpush3.msra.mxu0 %v291_v2  ;;  %v367_v11 = vld [vmem:[%s2007_s1] sm:$0xff]  ;;  %v1357_v17 = vld [vmem:[%s2008_s2 + $0x70] sm:$0xff]  ;;  %v1356_v18 = vld [vmem:[%s2008_s2 + $0x68] sm:$0xff]  ;;  %s275_s8 = scalar_lea.vmem %s2013_s7, %s1413_s28 }
  0x10   : > { %1490 = vmatprep.subr.mxu0 %v1654_v1  ;;  %v1359_v15 = vld [vmem:[%s2008_s2 + $0x80] sm:$0xff]  ;;  %v1354_v20 = vld [vmem:[%s2008_s2 + $0x58] sm:$0xff]  ;;  %v1353_v21 = vld [vmem:[%s2008_s2 + $0x50] sm:$0xff] }
  0x11   : > { %1491 = vmatpush3.msra.mxu0 %v290_v3  ;;  %v1355_v19 = vld [vmem:[%s2008_s2 + $0x60] sm:$0xff]  ;;  %v1352_v22 = vld [vmem:[%s2008_s2 + $0x48] sm:$0xff]  ;;  %v1373_v23 = vld [vmem:[%s2008_s2 + $0xd0] sm:$0xff] }
  0x12   : > { %1492 = vmatprep.subr.mxu0 %v1654_v1  ;;  %v1372_v24 = vld [vmem:[%s2008_s2 + $0xc8] sm:$0xff]  ;;  %v1371_v25 = vld [vmem:[%s2008_s2 + $0xc0] sm:$0xff]  ;;  %v1370_v26 = vld [vmem:[%s2008_s2 + $0xb8] sm:$0xff] }
  0x13   : > { %1493 = vmatpush3.msra.mxu0 %v289_v4  ;;  %v1369_v27 = vld [vmem:[%s2008_s2 + $0xb0] sm:$0xff]  ;;  %v1368_v28 = vld [vmem:[%s2008_s2 + $0xa8] sm:$0xff]  ;;  %v1367_v29 = vld [vmem:[%s2008_s2 + $0xa0] sm:$0xff] }
  0x14   : > { %1494 = vmatprep.subr.mxu0 %v1654_v1  ;;  %v1366_v30 = vld [vmem:[%s2008_s2 + $0x98] sm:$0xff]  ;;  %v1365_v31 = vld [vmem:[%s2008_s2 + $0x90] sm:$0xff]  ;;  %v1362_v34 = vld [vmem:[%s2007_s1 + $0x8] sm:$0xff] }
  0x15   : > { %1495 = vmatpush3.msra.mxu0 %v288_v5  ;;  %v1375_v37 = vld [vmem:[%s2007_s1 + $0x10] sm:$0xff]  ;;  %v782_v40 = vld [vmem:[%s2011_s5 + $0x38] sm:$0xf]  ;;  %v780_v42 = vld [vmem:[%s2011_s5 + $0x28] sm:$0xff] }
  0x16   : > { %1496 = vmatprep.subr.mxu0 %v1654_v1  ;;  %v781_v41 = vld [vmem:[%s2011_s5 + $0x30] sm:$0xff]  ;;  %v779_v43 = vld [vmem:[%s2011_s5 + $0x20] sm:$0xff]  ;;  %v778_v44 = vld [vmem:[%s2011_s5 + $0x18] sm:$0xff] }
  0x17   : > { %1497 = vmatpush3.msra.mxu0 %v287_v6  ;;  %v777_v45 = vld [vmem:[%s2011_s5 + $0x10] sm:$0xff]  ;;  %v776_v46 = vld [vmem:[%s2011_s5 + $0x8] sm:$0xff]  ;;  %v775_v47 = vld [vmem:[%s2011_s5] sm:$0xff] }
  0x18   : > { %1498 = vmatprep.subr.mxu0 %v1654_v1  ;;  %v1348_v50 = vld [vmem:[%s2009_s3] ss:$0 sm:$0xff]  ;;  %v1390_v57 = vld [vmem:[%s2011_s5 + $0x78] sm:$0xf]  ;;  %v1389_v59 = vld [vmem:[%s2011_s5 + $0x70] sm:$0xff] }
  0x19   : > { %1499 = vmatpush3.msra.mxu0 %v286_v7  ;;  %v1388_v60 = vld [vmem:[%s2011_s5 + $0x68] sm:$0xff]  ;;  %v1387_v61 = vld [vmem:[%s2011_s5 + $0x60] sm:$0xff]  ;;  %v1386_v62 = vld [vmem:[%s2011_s5 + $0x58] sm:$0xff] }
  0x1a   : > { %1500 = vmatprep.subr.mxu0 %v1654_v1  ;;  %v1385_v63 = vld [vmem:[%s2011_s5 + $0x50] sm:$0xff]  ;;  %v1384_v0 = vld [vmem:[%s2011_s5 + $0x48] sm:$0xff]  ;;  %v1383_v2 = vld [vmem:[%s2011_s5 + $0x40] sm:$0xff] }
  0x1b   : > { %1501 = vmatpush3.msra.mxu0 %v285_v8  ;;  %v860_v3 = vld [vmem:[%s2010_s4] sm:$0xff]  ;;  %v861_v5 = vld [vmem:[%s2010_s4 + $0x8] sm:$0xff]  ;;  %v1393_v6 = vld [vmem:[%s2010_s4 + $0x10] sm:$0xff] }
  0x1c   : > { %1502 = vmatprep.subr.mxu0 %v1654_v1 }
  0x1d   : > { %1503 = vmatpush3.msra.mxu0 %v284_v9  ;;  %v1394_v9 = vld [vmem:[%s2010_s4 + $0x18] sm:$0xff] }
  0x1e   : > { %1505 = vmatmul.mubr.msk.f32.vlgmr.msra.gmra.mxu0 %vm293_vm1, %v1750_v10  ;;  %1533 = vmatprep.subr.mxu0 %v1654_v1 }
  0x1f   : > { %1535 = vmatprep.mubr.msk.f32.mxu0 %vm1655_vm0, %v1654_v1 }
  0xde   : > { %v363_v12 = vpop.f32.mrf.mxu0 }
  0xdf   : > { %1508 = vmatpush3.msk.msra.mxu1 %vm372_vm2, %v363_v12  ;;  %v1403_v12 = vld [vmem:[%s2011_s5 + $0xb0] sm:$0xff] }
  0xe0   : > { %v1506_v14 = vpop.f32.mrf.mxu0  ;;  %1510 = vmatmul.mubr.msk.f32.vlgmr.msra.gmra.mxu1 %vm368_vm3, %v367_v11  ;;  %1512 = vmatprep.subr.mxu1 %v1654_v1 }
  0xe1   : > { %1513 = vmatpush3.msra.mxu1 %v1360_v13  ;;  %1530 = vmatprep.mubr.msk.f32.mxu1 %vm1655_vm0, %v1654_v1  ;;  %v1402_v13 = vld [vmem:[%s2011_s5 + $0xa8] sm:$0xff]  ;;  %v1401_v14 = vld [vmem:[%s2011_s5 + $0xa0] sm:$0xff] }
  0xe2   : > { %1514 = vmatprep.subr.mxu1 %v1654_v1 }
  0xe3   : > { %1515 = vmatpush3.msra.mxu1 %v1359_v15  ;;  %v1400_v15 = vld [vmem:[%s2011_s5 + $0x98] sm:$0xff] }
  0xe4   : > { %1516 = vmatprep.subr.mxu1 %v1654_v1 }
  0xe5   : > { %1517 = vmatpush3.msra.mxu1 %v1358_v16  ;;  %v1399_v16 = vld [vmem:[%s2011_s5 + $0x90] sm:$0xff] }
  0xe6   : > { %1518 = vmatprep.subr.mxu1 %v1654_v1 }
  0xe7   : > { %1519 = vmatpush3.msra.mxu1 %v1357_v17  ;;  %v1398_v17 = vld [vmem:[%s2011_s5 + $0x88] sm:$0xff] }
  0xe8   : > { %1520 = vmatprep.subr.mxu1 %v1654_v1 }
  0xe9   : > { %1521 = vmatpush3.msra.mxu1 %v1356_v18  ;;  %v1397_v18 = vld [vmem:[%s2011_s5 + $0x80] sm:$0xff] }
  0xea   : > { %1522 = vmatprep.subr.mxu1 %v1654_v1 }
  0xeb   : > { %1523 = vmatpush3.msra.mxu1 %v1355_v19  ;;  %v1407_v19 = vld [vmem:[%s2010_s4 + $0x20] sm:$0xff] }
  0xec   : > { %1524 = vmatprep.subr.mxu1 %v1654_v1 }
  0xed   : > { %1525 = vmatpush3.msra.mxu1 %v1354_v20 }
  0xee   : > { %1526 = vmatprep.subr.mxu1 %v1654_v1 }
  0xef   : > { %1527 = vmatpush3.msra.mxu1 %v1353_v21  ;;  %v1378_v21 = vld [vmem:[%s2012_s6] ss:$0 sm:$0xff] }
  0xf0   : > { %1528 = vmatprep.subr.mxu1 %v1654_v1 }
  0xf1   : > { %1529 = vmatpush3.msra.mxu1 %v1352_v22 }
  0xf2   : > { %1531 = vmatmul.mubr.msk.f32.vlgmr.msra.gmra.mxu1 %vm293_vm1, %v1750_v10  ;;  %1538 = vmatprep.subr.mxu1 %v1654_v1 }
  0xf3   : > { %1539 = vmatpush3.msra.mxu1 %v1373_v23  ;;  %1556 = vmatprep.mubr.msk.f32.mxu1 %vm1655_vm0, %v1654_v1 }
  0xf4   : > { %1540 = vmatprep.subr.mxu1 %v1654_v1 }
  0xf5   : > { %1541 = vmatpush3.msra.mxu1 %v1372_v24 }
  0xf6   : > { %1542 = vmatprep.subr.mxu1 %v1654_v1 }
  0xf7   : > { %1543 = vmatpush3.msra.mxu1 %v1371_v25 }
  0xf8   : > { %1544 = vmatprep.subr.mxu1 %v1654_v1 }
  0xf9   : > { %1545 = vmatpush3.msra.mxu1 %v1370_v26 }
  0xfa   : > { %1546 = vmatprep.subr.mxu1 %v1654_v1 }
  0xfb   : > { %1547 = vmatpush3.msra.mxu1 %v1369_v27 }
  0xfc   : > { %1548 = vmatprep.subr.mxu1 %v1654_v1 }
  0xfd   : > { %1549 = vmatpush3.msra.mxu1 %v1368_v28 }
  0xfe   : > { %1550 = vmatprep.subr.mxu1 %v1654_v1 }
  0xff   : > { %1551 = vmatpush3.msra.mxu1 %v1367_v29  ;;  %v1408_v29 = vld [vmem:[%s2010_s4 + $0x28] sm:$0xff] }
 0x100   : > { %1552 = vmatprep.subr.mxu1 %v1654_v1 }
 0x101   : > { %1553 = vmatpush3.msra.mxu1 %v1366_v30 }
 0x102   : > { %1554 = vmatprep.subr.mxu1 %v1654_v1 }
 0x103   : > { %1555 = vmatpush3.msra.mxu1 %v1365_v31 }
 0x104   : > { %1557 = vmatmul.mubr.msk.f32.vlgmr.msra.gmra.mxu1 %vm293_vm1, %v1750_v10  ;;  %v1404_v10 = vld [vmem:[%s2011_s5 + $0xb8] sm:$0xf] }
 0x105   : > { %1585 = vmatprep.mubr.msk.f32.mxu1 %vm862_vm6, %v860_v3 }
 0x1a0   : > { %v442_v32 = vpop.f32.mrf.mxu1 }
 0x1a1   : > { %v446_v51 = vadd.f32 %v1348_v50, %v442_v32 }
 0x1a2   : > { %v1511_v33 = vpop.f32.mrf.mxu1 }
 0x1b2   : > { %v523_v35 = vpop.f32.mrf.mxu1 }
 0x1b3   : > { %1534 = vmatpush3.msk.msra.mxu0 %vm372_vm2, %v523_v35 }
 0x1b4   : > { %v1532_v36 = vpop.f32.mrf.mxu1  ;;  %1536 = vmatmul.mubr.msk.f32.vlgmr.msra.gmra.mxu0 %vm368_vm3, %v1362_v34  ;;  %1559 = vmatprep.subr.mxu0 %v1654_v1 }
 0x1b5   : > { %1561 = vmatprep.mubr.msk.f32.mxu0 %vm1655_vm0, %v1654_v1 }
 0x1c4   : > { %v682_v38 = vpop.f32.mrf.mxu1 }
 0x1c5   : > { %1560 = vmatpush3.msk.msra.mxu0 %vm372_vm2, %v682_v38 }
 0x1c6   : > { %v1558_v39 = vpop.f32.mrf.mxu1  ;;  %1562 = vmatmul.mubr.msk.f32.vlgmr.msra.gmra.mxu0 %vm368_vm3, %v1375_v37  ;;  %1564 = vmatprep.subr.mxu0 %v1654_v1 }
 0x1c7   : > { %1580 = vmatprep.mubr.msk.f32.mxu0 %vm1655_vm0, %v1654_v1  ;;  %1565 = vmatpush3.msk.msra.mxu0 %vm372_vm2, %v782_v40 }
 0x1c8   : > { %1566 = vmatprep.subr.mxu0 %v1654_v1 }
 0x1c9   : > { %1567 = vmatpush3.msra.mxu0 %v781_v41 }
 0x1ca   : > { %1568 = vmatprep.subr.mxu0 %v1654_v1 }
 0x1cb   : > { %1569 = vmatpush3.msra.mxu0 %v780_v42 }
 0x1cc   : > { %1570 = vmatprep.subr.mxu0 %v1654_v1 }
 0x1cd   : > { %1571 = vmatpush3.msra.mxu0 %v779_v43 }
 0x1ce   : > { %1572 = vmatprep.subr.mxu0 %v1654_v1 }
 0x1cf   : > { %1573 = vmatpush3.msra.mxu0 %v778_v44 }
 0x1d0   : > { %1574 = vmatprep.subr.mxu0 %v1654_v1 }
 0x1d1   : > { %1575 = vmatpush3.msra.mxu0 %v777_v45 }
 0x1d2   : > { %1576 = vmatprep.subr.mxu0 %v1654_v1 }
 0x1d3   : > { %1577 = vmatpush3.msra.mxu0 %v776_v46 }
 0x1d4   : > { %1578 = vmatprep.subr.mxu0 %v1654_v1 }
 0x1d5   : > { %1579 = vmatpush3.msra.mxu0 %v775_v47 }
 0x1d6   : > { %1588 = vmatprep.subr.mxu0 %v1654_v1 }
 0x274   : > { %v601_v48 = vpop.f32.mrf.mxu0 }
 0x275   : > { %v605_v52 = vadd.f32 %v601_v48, %v446_v51 }
 0x276   : > { %v1537_v49 = vpop.f32.mrf.mxu0 }
 0x286   : > { %v760_v53 = vpop.f32.mrf.mxu0 }
 0x287   : > { %v764_v54 = vadd.f32 %v760_v53, %v605_v52 }
 0x288   : > { %v1563_v55 = vpop.f32.mrf.mxu0 }
 0x289   : > { %vm765_vm4 = vcmp.ge.f32.partialorder %v764_v54, 0.0  ;;  %v766_v56 = vmul.f32 0.2, %v764_v54 }
 0x28b   : > { %v1898_v58 = vsel %vm765_vm4, %v764_v54, %v766_v56 }
 0x28c   : > { %1581 = vmatmul.mubr.msk.f32.vlgmr.msra.gmra.mxu0 %vm783_vm5, %v1898_v58 }
 0x28d   : > { %1589 = vmatpush3.msk.msra.mxu0 %vm372_vm2, %v1390_v57  ;;  %1604 = vmatprep.mubr.msk.f32.mxu0 %vm1655_vm0, %v1654_v1 }
 0x28e   : > { %1590 = vmatprep.subr.mxu0 %v1654_v1 }
 0x28f   : > { %1591 = vmatpush3.msra.mxu0 %v1389_v59 }
 0x290   : > { %1592 = vmatprep.subr.mxu0 %v1654_v1 }
 0x291   : > { %1593 = vmatpush3.msra.mxu0 %v1388_v60 }
 0x292   : > { %1594 = vmatprep.subr.mxu0 %v1654_v1 }
 0x293   : > { %1595 = vmatpush3.msra.mxu0 %v1387_v61 }
 0x294   : > { %1596 = vmatprep.subr.mxu0 %v1654_v1 }
 0x295   : > { %1597 = vmatpush3.msra.mxu0 %v1386_v62 }
 0x296   : > { %1598 = vmatprep.subr.mxu0 %v1654_v1 }
 0x297   : > { %1599 = vmatpush3.msra.mxu0 %v1385_v63 }
 0x298   : > { %1600 = vmatprep.subr.mxu0 %v1654_v1 }
 0x299   : > { %1601 = vmatpush3.msra.mxu0 %v1384_v0 }
 0x29a   : > { %1602 = vmatprep.subr.mxu0 %v1654_v1 }
 0x29b   : > { %1603 = vmatpush3.msra.mxu0 %v1383_v2 }
 0x29c   : > { %1605 = vmatmul.mubr.msk.f32.vlgmr.msra.gmra.mxu0 %vm783_vm5, %v1898_v58 }
 0x29d   : > { %1633 = vmatprep.mubr.msk.f32.mxu0 %vm862_vm6, %v1407_v19 }
 0x34c   : > { %v856_v4 = vpop.f32.mrf.mxu0 }
 0x34d   : > { %1583 = vmatprep.subr.mxu1 %v856_v4 }
 0x34e   : > { %v1582_v7 = vpop.f32.mrf.mxu0  ;;  %1584 = vmatpush3.msra.mxu1 %v856_v4 }
 0x34f   : > { %1586 = vmatmul.mubr.msk.f32.vlgmr.msra.gmra.mxu1 %vm862_vm6, %v861_v5 }
 0x350   : > { %1609 = vmatprep.mubr.msk.f32.mxu1 %vm862_vm6, %v1393_v6 }
 0x35c   : > { %v1024_v8 = vpop.f32.mrf.mxu0 }
 0x35d   : > { %1607 = vmatprep.subr.mxu1 %v1024_v8 }
 0x35e   : > { %v1606_v11 = vpop.f32.mrf.mxu0  ;;  %1608 = vmatpush3.msra.mxu1 %v1024_v8 }
 0x35f   : > { %1610 = vmatmul.mubr.msk.f32.vlgmr.msra.gmra.mxu1 %vm862_vm6, %v1394_v9  ;;  %1612 = vmatprep.subr.mxu1 %v1654_v1 }
 0x360   : > { %1613 = vmatpush3.msk.msra.mxu1 %vm372_vm2, %v1404_v10  ;;  %1628 = vmatprep.mubr.msk.f32.mxu1 %vm1655_vm0, %v1654_v1 }
 0x361   : > { %1614 = vmatprep.subr.mxu1 %v1654_v1 }
 0x362   : > { %1615 = vmatpush3.msra.mxu1 %v1403_v12 }
 0x363   : > { %1616 = vmatprep.subr.mxu1 %v1654_v1 }
 0x364   : > { %1617 = vmatpush3.msra.mxu1 %v1402_v13 }
 0x365   : > { %1618 = vmatprep.subr.mxu1 %v1654_v1 }
 0x366   : > { %1619 = vmatpush3.msra.mxu1 %v1401_v14 }
 0x367   : > { %1620 = vmatprep.subr.mxu1 %v1654_v1 }
 0x368   : > { %1621 = vmatpush3.msra.mxu1 %v1400_v15 }
 0x369   : > { %1622 = vmatprep.subr.mxu1 %v1654_v1 }
 0x36a   : > { %1623 = vmatpush3.msra.mxu1 %v1399_v16 }
 0x36b   : > { %1624 = vmatprep.subr.mxu1 %v1654_v1 }
 0x36c   : > { %1625 = vmatpush3.msra.mxu1 %v1398_v17 }
 0x36d   : > { %1626 = vmatprep.subr.mxu1 %v1654_v1 }
 0x36e   : > { %1627 = vmatpush3.msra.mxu1 %v1397_v18 }
 0x36f   : > { %1629 = vmatmul.mubr.msk.f32.vlgmr.msra.gmra.mxu1 %vm783_vm5, %v1898_v58 }
 0x40f   : > { %v1587_v20 = vpop.f32.mrf.mxu1 }
 0x410   : > { %v945_v23 = vadd.f32 %v1587_v20, %v1378_v21 }
 0x411   : > { %v935_v22 = vpop.f32.mrf.mxu1 }
 0x412   : > { %v944_v1 = vadd.f32 %v1378_v21, %v935_v22 }
 0x41f   : > { %v1611_v24 = vpop.f32.mrf.mxu1 }
 0x420   : > { %v1113_v25 = vadd.f32 %v1611_v24, %v945_v23 }
 0x421   : > { %v1103_v26 = vpop.f32.mrf.mxu1 }
 0x422   : > { %v1112_v27 = vadd.f32 %v1103_v26, %v944_v1 }
 0x42f   : > { %v1192_v28 = vpop.f32.mrf.mxu1 }
 0x430   : > { %1631 = vmatprep.subr.mxu0 %v1192_v28 }
 0x431   : > { %v1630_v30 = vpop.f32.mrf.mxu1  ;;  %1632 = vmatpush3.msra.mxu0 %v1192_v28 }
 0x432   : > { %1634 = vmatmul.mubr.msk.f32.vlgmr.msra.gmra.mxu0 %vm862_vm6, %v1408_v29 }
 0x4f2   : > { %v1635_v31 = vpop.f32.mrf.mxu0 }
 0x4f3   : > { %v1281_v32 = vadd.f32 %v1635_v31, %v1113_v25 }
 0x4f4   : > { %v1271_v33 = vpop.f32.mrf.mxu0 }
 0x4f5   : > { %1284 = vst.msk [vmem:[%s275_s8 + $0x8] sm:$0xff] %vm1282_vm7, %v1281_v32  ;;  %v1280_v34 = vadd.f32 %v1271_v33, %v1112_v27 }
 0x4f7   : > { %1283 = vst.msk [vmem:[%s275_s8] sm:$0xff] %vm1282_vm7, %v1280_v34 }
 0x4f8 PF: > { %s17_s24 = sadd.s32 1, %s1652_s24  }
 0x4f9   : > { %p14_p4 = scmp.ge.s32.totalorder %s17_s24, 4  }
 0x4fb   :  { %16 = sbr.rel (!%p14_p4) target bundleno = 1 (0x1), region = 86 }

</bundles_post_ra>
